<compile_context>
chip_gen: v6e
topology: v6e:2x2x1
jax: 0.10.0
libtpu: 0.0.40
codegen_flags: <defaults>
</compile_context>

<pallas_src>
import functools

import numpy as np
import jax
import jax.numpy as jnp
from jax import lax
from jax.experimental import pallas as pl
from jax.experimental.pallas import tpu as pltpu

_NEG_BIG = -1e30          # finite "-inf" so masked lanes never produce NaNs
_SUBLANE = 8
_LANE = 128


def _round_up(x, m):
    return ((x + m - 1) // m) * m


def _sum_all(x):
    # lane reduce then sublane reduce -> (1, 1)
    return jnp.sum(jnp.sum(x, axis=1, keepdims=True), axis=0, keepdims=True)


_VMEM_CAP_CACHE = None


def _vmem_capacity_bytes():
    """Best-effort physical VMEM size; falls back to the conservative 64 MiB."""
    global _VMEM_CAP_CACHE
    if _VMEM_CAP_CACHE is None:
        try:
            _VMEM_CAP_CACHE = int(pltpu.get_tpu_info().vmem_capacity_bytes)
        except Exception:
            _VMEM_CAP_CACHE = 64 * 1024 * 1024
    return _VMEM_CAP_CACHE


# ---------------------------------------------------------------------------
# ITC + ITM (tiny, single block)
# ---------------------------------------------------------------------------
def _itc_itm_kernel(img_ref, txt_ref, w_img_ref, w_txt_ref, b_ref,
                    itc_ref, itm_ref, *, temperature):
    img = img_ref[...].astype(jnp.float32)            # (B, D)
    txt = txt_ref[...].astype(jnp.float32)            # (B, D)
    B = img.shape[0]

    # F.normalize(dim=-1), eps=1e-12
    img_n = img / jnp.maximum(
        jnp.sqrt(jnp.sum(img * img, axis=-1, keepdims=True)), 1e-12)
    txt_n = txt / jnp.maximum(
        jnp.sqrt(jnp.sum(txt * txt, axis=-1, keepdims=True)), 1e-12)

    # Two small MXU matmuls so both CE directions use lane-major row-wise LSEs.
    logits_i = jnp.einsum("id,td->it", img_n, txt_n,
                          preferred_element_type=jnp.float32) / temperature
    logits_t = jnp.einsum("td,id->ti", txt_n, img_n,
                          preferred_element_type=jnp.float32) / temperature

    rid = lax.broadcasted_iota(jnp.int32, (B, B), 0)
    cid = lax.broadcasted_iota(jnp.int32, (B, B), 1)
    diag_sum = _sum_all(jnp.where(rid == cid, logits_i, 0.0))  # same diag both dirs

    def _row_lse(x):
        m = jnp.max(x, axis=1, keepdims=True)
        return m + jnp.log(jnp.sum(jnp.exp(x - m), axis=1, keepdims=True))

    loss_i2t = (_sum_all(_row_lse(logits_i)) - diag_sum) / B
    loss_t2i = (_sum_all(_row_lse(logits_t)) - diag_sum) / B
    itc_ref[...] = 0.5 * (loss_i2t + loss_t2i)

    # ITM: linear head on cat([img_n, txt_n]) (img first, matching the module),
    # labels are all 1.  Only 2 output classes -> VPU multiplies + lane reduces.
    w_img = w_img_ref[...].astype(jnp.float32)        # (2, D) acts on img_n
    w_txt = w_txt_ref[...].astype(jnp.float32)        # (2, D) acts on txt_n
    b = b_ref[...].astype(jnp.float32)                # (1, 2)
    logit0 = (jnp.sum(img_n * w_img[0:1, :], axis=1, keepdims=True)
              + jnp.sum(txt_n * w_txt[0:1, :], axis=1, keepdims=True)
              + b[:, 0:1])
    logit1 = (jnp.sum(img_n * w_img[1:2, :], axis=1, keepdims=True)
              + jnp.sum(txt_n * w_txt[1:2, :], axis=1, keepdims=True)
              + b[:, 1:2])
    m = jnp.maximum(logit0, logit1)
    lse = m + jnp.log(jnp.exp(logit0 - m) + jnp.exp(logit1 - m))
    itm_ref[...] = _sum_all(lse - logit1) / B


# ---------------------------------------------------------------------------
# ITG: streamed token-level cross entropy (online logsumexp over vocab tiles)
# ---------------------------------------------------------------------------
def _itg_kernel(lm_ref, tgt_ref, sum_ref, m_sc, l_sc, p_sc,
                *, n_rows, vocab, use_mxu_sum):
    i = pl.program_id(0)                 # row-tile axis ("parallel")
    v = pl.program_id(1)                 # vocab-tile axis ("arbitrary", innermost)
    n_v = pl.num_programs(1)
    tile_n, tile_v = lm_ref.shape

    @pl.when(v == 0)
    def _():
        m_sc[...] = jnp.full(m_sc.shape, _NEG_BIG, jnp.float32)
        l_sc[...] = jnp.zeros(l_sc.shape, jnp.float32)
        p_sc[...] = jnp.zeros(p_sc.shape, jnp.float32)

    x = lm_ref[...]                                     # NATIVE dtype (bf16 stays packed)
    col = lax.broadcasted_iota(jnp.int32, (tile_n, tile_v), 1)   # tile-local columns
    tgt_local = tgt_ref[...] - v * tile_v               # (tile_n, 1): O(rows) work only

    def _lane_sum(e):
        if use_mxu_sum:
            # Offload the O(rows*vocab) accumulation adds to the idle MXU slot.
            ones = jnp.ones((tile_v, _LANE), jnp.float32)
            return jnp.dot(e, ones, preferred_element_type=jnp.float32)[:, :1]
        return jnp.sum(e, axis=1, keepdims=True)

    def _update(xt):
        # Fused masked gather of the target logit; exactly one vocab tile matches,
        # so the select/sum can stay in the native (packed) dtype exactly.
        p_sc[...] = p_sc[...] + jnp.sum(
            jnp.where(col == tgt_local, xt, jnp.zeros((), xt.dtype)),
            axis=1, keepdims=True).astype(jnp.float32)
        # Online logsumexp: max in native dtype, cast only for the exp path.
        m_prev = m_sc[...]
        m_new = jnp.maximum(
            m_prev, jnp.max(xt, axis=1, keepdims=True).astype(jnp.float32))
        e = jnp.exp(xt.astype(jnp.float32) - m_new)
        l_sc[...] = l_sc[...] * jnp.exp(m_prev - m_new) + _lane_sum(e)
        m_sc[...] = m_new

    rem = vocab % tile_v                                # static
    if rem == 0:
        _update(x)
    else:
        # Mask the edge-padded vocab columns ONLY on the last vocab tile; every
        # full tile runs the cheap unmasked path.
        @pl.when(v < n_v - 1)
        def _():
            _update(x)

        @pl.when(v == n_v - 1)
        def _():
            _update(jnp.where(col < rem, x.astype(jnp.float32), _NEG_BIG))

    @pl.when(v == n_v - 1)
    def _():
        lse = m_sc[...] + jnp.log(l_sc[...])            # (tile_n, 1)
        row = lax.broadcasted_iota(jnp.int32, (tile_n, 1), 0) + i * tile_n
        # drop the per-sequence sentinel / ignore_index (<0) labels and pad rows
        valid = (tgt_ref[...] >= 0) & (row < n_rows)
        nll = jnp.where(valid, lse - p_sc[...], 0.0)
        sum_ref[...] = jnp.broadcast_to(_sum_all(nll), sum_ref.shape)


def _choose_itg_tiles(n_rows, vocab, itemsize, vmem_cap):
    small_vmem = vmem_cap <= 80 * 1024 * 1024           # v7x-class (64 MiB, 2 TCs)
    # Vocab (lane) axis: whole vocab if small, else stream 128-aligned tiles with
    # the online LSE.  Smaller tiles on small-VMEM chips keep the per-step f32
    # temporaries well inside the scoped limit.
    tile_v_target = 2048 if small_vmem else 4096
    tile_v = vocab if vocab <= tile_v_target else tile_v_target
    # Row (sublane) axis: per-pipeline-buffer budget, generation-aware.
    buf_budget = (4 if small_vmem else 12) * 1024 * 1024
    max_rows = 512 if small_vmem else 1024
    tile_n = min(max_rows, buf_budget // (tile_v * itemsize),
                 _round_up(n_rows, _SUBLANE))
    if small_vmem and n_rows > _SUBLANE:
        # >= 2 row tiles so the "parallel" row axis spans both v7x TensorCores.
        tile_n = min(tile_n, _round_up(pl.cdiv(n_rows, 2), _SUBLANE))
    tile_n = max(_SUBLANE, (tile_n // _SUBLANE) * _SUBLANE)
    return tile_n, tile_v


def _itg_sum_and_count(lm_logits, lm_labels, *, tile_n=None, tile_v=None):
    """Returns (sum of per-token NLLs, number of valid tokens)."""
    vocab = lm_logits.shape[-1]
    seq = lm_logits.shape[-2]
    lm_flat = lm_logits.reshape(-1, vocab)       # contiguous reshape (free under jit)
    n_rows = lm_flat.shape[0]

    # Next-token targets for every flat row.  The last token of each sequence gets
    # sentinel -1 instead of slicing/copying the big logits tensor; negative labels
    # (ignore_index=-100) are masked in-kernel too.
    lbl = lm_labels.reshape(-1, seq).astype(jnp.int32)
    tgt = jnp.concatenate(
        [lbl[:, 1:], jnp.full((lbl.shape[0], 1), -1, jnp.int32)], axis=1)
    tgt = tgt.reshape(n_rows, 1)

    itemsize = lm_flat.dtype.itemsize
    vmem_cap = _vmem_capacity_bytes()
    small_vmem = vmem_cap <= 80 * 1024 * 1024
    auto_n, auto_v = _choose_itg_tiles(n_rows, vocab, itemsize, vmem_cap)
    tile_n = auto_n if tile_n is None else tile_n
    tile_v = auto_v if tile_v is None else min(tile_v, vocab)   # keep tile 0 real
    assert tile_n % _SUBLANE == 0, "itg_tile_n must be a multiple of 8"
    assert tile_v == vocab or tile_v % _LANE == 0, (
        "itg_tile_v must equal vocab or be a multiple of 128")
    n_rt = pl.cdiv(n_rows, tile_n)
    n_vt = pl.cdiv(vocab, tile_v)

    use_mxu_sum = (tile_v % _LANE == 0) and (tile_v >= 1024)

    # VMEM accounting: lm + tgt double-buffers, lane-padded (tile_n,1) scratch,
    # headroom for compiler-materialized f32 tile temporaries.
    in_buf = 2 * tile_n * tile_v * itemsize
    tgt_buf = 2 * tile_n * _LANE * 4
    scratch = 3 * tile_n * _LANE * 4
    temps = 3 * tile_n * tile_v * 4
    need = in_buf + tgt_buf + scratch + temps + (4 << 20)
    cap = (48 << 20) if small_vmem else (100 << 20)
    vmem_limit = int(min(cap, max(32 << 20, need)))

    cost = pl.CostEstimate(
        flops=int(6 * n_rows * vocab),
        transcendentals=int(n_rows * vocab),
        bytes_accessed=int(n_rows * vocab * itemsize + n_rows * 4
                           + n_rt * _SUBLANE * _LANE * 4))

    kernel = functools.partial(_itg_kernel, n_rows=n_rows, vocab=vocab,
                               use_mxu_sum=use_mxu_sum)
    sums = pl.pallas_call(
        kernel,
        grid=(n_rt, n_vt),
        in_specs=[pl.BlockSpec((tile_n, tile_v), lambda i, v: (i, v)),
                  pl.BlockSpec((tile_n, 1), lambda i, v: (i, 0))],
        out_specs=pl.BlockSpec((_SUBLANE, _LANE), lambda i, v: (i, 0)),
        out_shape=jax.ShapeDtypeStruct((n_rt * _SUBLANE, _LANE), jnp.float32),
        scratch_shapes=[pltpu.VMEM((tile_n, 1), jnp.float32),
                        pltpu.VMEM((tile_n, 1), jnp.float32),
                        pltpu.VMEM((tile_n, 1), jnp.float32)],
        compiler_params=pltpu.CompilerParams(
            dimension_semantics=("parallel", "arbitrary"),
            vmem_limit_bytes=vmem_limit),
        cost_estimate=cost,
    )(lm_flat, tgt)

    itg_sum = jnp.sum(sums.reshape(n_rt, _SUBLANE * _LANE)[:, 0])
    # valid-token count from the tiny label tensor (no kernel output needed)
    itg_cnt = jnp.sum((tgt >= 0).astype(jnp.float32))
    return itg_sum, itg_cnt


# ---------------------------------------------------------------------------
# Public wrapper (equivalent of MultiModalITLoss.forward)
# ---------------------------------------------------------------------------
def multimodal_it_loss(img_feats, txt_feats, itm_weight_mat, itm_bias,
                       lm_logits=None, lm_labels=None, *,
                       temperature=0.07, itc_weight=1.0, itg_weight=1.0,
                       itm_weight=1.0, itg_tile_n=None, itg_tile_v=None):
    """itm_weight_mat: (2, 2*D) nn.Linear weight (concat order [img, txt]); itm_bias: (2,).

    Note: if every ITG label is ignored, PyTorch CE returns NaN; this kernel
    returns 0 for that degenerate case (the divisor is clamped to 1).
    """
    B, D = img_feats.shape
    w_img = itm_weight_mat[:, :D]              # (2, D) multiplies normalized img feats
    w_txt = itm_weight_mat[:, D:]              # (2, D) multiplies normalized txt feats
    b = itm_bias.reshape(1, 2)

    def full(shape):
        return pl.BlockSpec(shape, lambda i, s=shape: (0,) * len(s))

    # TODO(synk): for very large contrastive batches (B >~ 1024) switch to a
    # B-tiled variant with an online LSE over the key axis; single-block is fine
    # for typical BLIP-2 batch sizes.
    small_vmem = _vmem_capacity_bytes() <= 80 * 1024 * 1024
    itc_need = 4 * (8 * B * D + 4 * B * B) + (2 << 20)
    itc_vmem = int(min((48 << 20) if small_vmem else (100 << 20),
                       max(16 << 20, itc_need)))

    itc, itm = pl.pallas_call(
        functools.partial(_itc_itm_kernel, temperature=float(temperature)),
        grid=(1,),
        in_specs=[full(img_feats.shape), full(txt_feats.shape),
                  full(w_img.shape), full(w_txt.shape), full(b.shape)],
        out_specs=(full((1, 1)), full((1, 1))),
        out_shape=(jax.ShapeDtypeStruct((1, 1), jnp.float32),
                   jax.ShapeDtypeStruct((1, 1), jnp.float32)),
        compiler_params=pltpu.CompilerParams(
            dimension_semantics=("arbitrary",),
            vmem_limit_bytes=itc_vmem),
    )(img_feats, txt_feats, w_img, w_txt, b)
    itc = itc[0, 0]
    itm = itm[0, 0]

    if lm_logits is not None and lm_labels is not None:
        itg_sum, itg_cnt = _itg_sum_and_count(
            lm_logits, lm_labels, tile_n=itg_tile_n, tile_v=itg_tile_v)
        itg = itg_sum / jnp.maximum(itg_cnt, 1.0)
    else:
        itg = jnp.zeros((), jnp.float32)

    total = itc_weight * itc + itm_weight * itm + itg_weight * itg
    return total, {"itc": itc, "itm": itm, "itg": itg}


# ---------------------------------------------------------------------------
# Self-test
# ---------------------------------------------------------------------------
def _reference(img_feats, txt_feats, itm_w, itm_b, lm_logits, lm_labels,
               temperature=0.07):
    img_n = img_feats.astype(jnp.float32)
    img_n = img_n / jnp.maximum(jnp.linalg.norm(img_n, axis=-1, keepdims=True), 1e-12)
    txt_n = txt_feats.astype(jnp.float32)
    txt_n = txt_n / jnp.maximum(jnp.linalg.norm(txt_n, axis=-1, keepdims=True), 1e-12)
    B = img_n.shape[0]
    logits = img_n @ txt_n.T / temperature
    tgt = jnp.arange(B)
    lp_i = jax.nn.log_softmax(logits, axis=-1)
    lp_t = jax.nn.log_softmax(logits.T, axis=-1)
    itc = 0.5 * (-jnp.mean(lp_i[tgt, tgt]) - jnp.mean(lp_t[tgt, tgt]))
    concat = jnp.concatenate([img_n, txt_n], axis=-1)
    itm_logits = concat @ itm_w.astype(jnp.float32).T + itm_b.astype(jnp.float32)
    itm = -jnp.mean(jax.nn.log_softmax(itm_logits, axis=-1)[:, 1])
    V = lm_logits.shape[-1]
    sl = lm_logits[:, :-1, :].reshape(-1, V).astype(jnp.float32)
    slbl = lm_labels[:, 1:].reshape(-1)
    lp = jax.nn.log_softmax(sl, axis=-1)
    valid = slbl >= 0
    idx = jnp.where(valid, slbl, 0)
    nll = -lp[jnp.arange(sl.shape[0]), idx]
    itg = jnp.sum(jnp.where(valid, nll, 0.0)) / jnp.maximum(jnp.sum(valid), 1)
    return itc + itm + itg, itc, itm, itg


if __name__ == "__main__":
    key = jax.random.PRNGKey(0)

    def run_case(B, D, S, dtype, tile_n, tile_v, subkey, with_ignore):
        vocab = 2 * D            # itm_head in_features == 2*D == vocab_size
        k1, k2, k3, k4, k5, k6 = jax.random.split(subkey, 6)
        img = jax.random.normal(k1, (B, D), jnp.float32)
        txt = jax.random.normal(k2, (B, D), jnp.float32)
        lm = jax.random.normal(k3, (B, S, vocab), jnp.float32).astype(dtype)
        lbl = jax.random.randint(k4, (B, S), 0, vocab, jnp.int32)
        if with_ignore:
            lbl = lbl.at[:, ::3].set(-100)     # PyTorch CE ignore_index tokens
        bound = 1.0 / np.sqrt(vocab)
        itm_w = jax.random.uniform(k5, (2, vocab), jnp.float32, -bound, bound)
        itm_b = jax.random.uniform(k6, (2,), jnp.float32, -bound, bound)

        fn = jax.jit(functools.partial(multimodal_it_loss,
                                       itg_tile_n=tile_n, itg_tile_v=tile_v))
        total, parts = fn(img, txt, itm_w, itm_b, lm, lbl)
        jax.block_until_ready(total)

        r_total, r_itc, r_itm, r_itg = _reference(img, txt, itm_w, itm_b, lm, lbl)
        np.testing.assert_allclose(np.array(total), np.array(r_total), rtol=1e-4, atol=1e-5)
        np.testing.assert_allclose(np.array(parts["itc"]), np.array(r_itc), rtol=1e-4, atol=1e-5)
        np.testing.assert_allclose(np.array(parts["itm"]), np.array(r_itm), rtol=1e-4, atol=1e-5)
        np.testing.assert_allclose(np.array(parts["itg"]), np.array(r_itg), rtol=1e-4, atol=1e-5)

    k_a, k_b, k_c = jax.random.split(key, 3)
    # (a) auto tiling, f32 logits, no ignored labels, whole-vocab tile path.
    run_case(B=8, D=32, S=8, dtype=jnp.float32, tile_n=None, tile_v=None,
             subkey=k_a, with_ignore=False)
    # (b) forced multi-tile path: bf16 logits streamed in (16, 128) blocks with a
    #     partial row tile (B*S=72), a partial vocab tile (320 % 128 != 0,
    #     exercising the last-tile-only mask branch) and ignore_index=-100 labels.
    run_case(B=8, D=160, S=9, dtype=jnp.bfloat16, tile_n=16, tile_v=128,
             subkey=k_b, with_ignore=True)
    # (c) vocab=2048 bf16: exercises the MXU ones-matmul lane-sum path.
    run_case(B=2, D=1024, S=8, dtype=jnp.bfloat16, tile_n=None, tile_v=None,
             subkey=k_c, with_ignore=True)

    print("KERNEL_OK")
</pallas_src>

<mosaic_0001>
module attributes {stable_mosaic.version = 11 : i64} {
  func.func @_itc_itm_kernel(%arg0: i32, %arg1: memref<8x32xf32, #tpu.memory_space<vmem>>, %arg2: memref<8x32xf32, #tpu.memory_space<vmem>>, %arg3: memref<2x32xf32, #tpu.memory_space<vmem>>, %arg4: memref<2x32xf32, #tpu.memory_space<vmem>>, %arg5: memref<1x2xf32, #tpu.memory_space<vmem>>, %arg6: memref<1x1xf32, #tpu.memory_space<vmem>>, %arg7: memref<1x1xf32, #tpu.memory_space<vmem>>) attributes {dimension_semantics = [#tpu.dimension_semantics<arbitrary>], iteration_bounds = array<i64: 1>, scalar_prefetch = 0 : i64, scratch_operands = 0 : i64, tpu.core_type = #tpu.core_type<tc>, window_params = [{pipeline_mode = #tpu.pipeline_mode<synchronous>, transform_indices = @transform_0, window_bounds = array<i64: 8, 32>}, {pipeline_mode = #tpu.pipeline_mode<synchronous>, transform_indices = @transform_1, window_bounds = array<i64: 8, 32>}, {pipeline_mode = #tpu.pipeline_mode<synchronous>, transform_indices = @transform_2, window_bounds = array<i64: 2, 32>}, {pipeline_mode = #tpu.pipeline_mode<synchronous>, transform_indices = @transform_3, window_bounds = array<i64: 2, 32>}, {pipeline_mode = #tpu.pipeline_mode<synchronous>, transform_indices = @transform_4, window_bounds = array<i64: 1, 2>}, {pipeline_mode = #tpu.pipeline_mode<synchronous>, transform_indices = @transform_5, window_bounds = array<i64: 1, 1>}, {pipeline_mode = #tpu.pipeline_mode<synchronous>, transform_indices = @transform_6, window_bounds = array<i64: 1, 1>}]} {
    %c0 = arith.constant 0 : index
    %c0_0 = arith.constant 0 : index
    %0 = vector.load %arg1[%c0, %c0_0] : memref<8x32xf32, #tpu.memory_space<vmem>>, vector<8x32xf32>
    %c0_1 = arith.constant 0 : index
    %c0_2 = arith.constant 0 : index
    %1 = vector.load %arg2[%c0_1, %c0_2] : memref<8x32xf32, #tpu.memory_space<vmem>>, vector<8x32xf32>
    %2 = arith.mulf %0, %0 : vector<8x32xf32>
    %cst = arith.constant dense<0.000000e+00> : vector<8xf32>
    %3 = vector.multi_reduction <add>, %2, %cst [1] : vector<8x32xf32> to vector<8xf32>
    %4 = vector.shape_cast %3 : vector<8xf32> to vector<8x1xf32>
    %5 = math.sqrt %4 : vector<8x1xf32>
    %cst_3 = arith.constant 9.99999996E-13 : f32
    %6 = vector.broadcast %cst_3 : f32 to vector<8x1xf32>
    %7 = arith.maximumf %5, %6 : vector<8x1xf32>
    %8 = vector.broadcast %7 : vector<8x1xf32> to vector<8x32xf32>
    %9 = arith.divf %0, %8 : vector<8x32xf32>
    %10 = arith.mulf %1, %1 : vector<8x32xf32>
    %cst_4 = arith.constant dense<0.000000e+00> : vector<8xf32>
    %11 = vector.multi_reduction <add>, %10, %cst_4 [1] : vector<8x32xf32> to vector<8xf32>
    %12 = vector.shape_cast %11 : vector<8xf32> to vector<8x1xf32>
    %13 = math.sqrt %12 : vector<8x1xf32>
    %cst_5 = arith.constant 9.99999996E-13 : f32
    %14 = vector.broadcast %cst_5 : f32 to vector<8x1xf32>
    %15 = arith.maximumf %13, %14 : vector<8x1xf32>
    %16 = vector.broadcast %15 : vector<8x1xf32> to vector<8x32xf32>
    %17 = arith.divf %1, %16 : vector<8x32xf32>
    "tpu.trace_start"() <{level = 10 : i32, message = "id,td->it"}> : () -> ()
    %cst_6 = arith.constant dense<0.000000e+00> : vector<8x8xf32>
    %18 = tpu.matmul %9, %17, %cst_6 {dimension_numbers = #tpu.dot_dimension_numbers<[1], [1], [0], [0], [0, 0, 1, 0], [], []>} : vector<8x32xf32>, vector<8x32xf32>, vector<8x8xf32> -> vector<8x8xf32>
    "tpu.trace_stop"() : () -> ()
    %cst_7 = arith.constant 7.000000e-02 : f32
    %19 = vector.broadcast %cst_7 : f32 to vector<8x8xf32>
    %20 = arith.divf %18, %19 : vector<8x8xf32>
    "tpu.trace_start"() <{level = 10 : i32, message = "td,id->ti"}> : () -> ()
    %cst_8 = arith.constant dense<0.000000e+00> : vector<8x8xf32>
    %21 = tpu.matmul %17, %9, %cst_8 {dimension_numbers = #tpu.dot_dimension_numbers<[1], [1], [0], [0], [0, 0, 1, 0], [], []>} : vector<8x32xf32>, vector<8x32xf32>, vector<8x8xf32> -> vector<8x8xf32>
    "tpu.trace_stop"() : () -> ()
    %cst_9 = arith.constant 7.000000e-02 : f32
    %22 = vector.broadcast %cst_9 : f32 to vector<8x8xf32>
    %23 = arith.divf %21, %22 : vector<8x8xf32>
    %24 = tpu.iota {dimensions = array<i32: 0>} : vector<8x8xi32>
    %25 = tpu.iota {dimensions = array<i32: 1>} : vector<8x8xi32>
    %26 = arith.cmpi eq, %24, %25 : vector<8x8xi32>
    %cst_10 = arith.constant 0.000000e+00 : f32
    %27 = vector.broadcast %cst_10 : f32 to vector<8x8xf32>
    %28 = arith.select %26, %20, %27 : vector<8x8xi1>, vector<8x8xf32>
    %cst_11 = arith.constant dense<0.000000e+00> : vector<8xf32>
    %29 = vector.multi_reduction <add>, %28, %cst_11 [1] : vector<8x8xf32> to vector<8xf32>
    %30 = vector.shape_cast %29 : vector<8xf32> to vector<8x1xf32>
    %cst_12 = arith.constant dense<0.000000e+00> : vector<1xf32>
    %31 = vector.multi_reduction <add>, %30, %cst_12 [0] : vector<8x1xf32> to vector<1xf32>
    %32 = vector.shape_cast %31 : vector<1xf32> to vector<1x1xf32>
    %cst_13 = arith.constant dense<0xFF800000> : vector<8xf32>
    %33 = vector.multi_reduction <maximumf>, %20, %cst_13 [1] : vector<8x8xf32> to vector<8xf32>
    %34 = vector.shape_cast %33 : vector<8xf32> to vector<8x1xf32>
    %35 = vector.broadcast %34 : vector<8x1xf32> to vector<8x8xf32>
    %36 = arith.subf %20, %35 : vector<8x8xf32>
    %37 = math.exp %36 : vector<8x8xf32>
    %cst_14 = arith.constant dense<0.000000e+00> : vector<8xf32>
    %38 = vector.multi_reduction <add>, %37, %cst_14 [1] : vector<8x8xf32> to vector<8xf32>
    %39 = vector.shape_cast %38 : vector<8xf32> to vector<8x1xf32>
    %40 = math.log %39 : vector<8x1xf32>
    %41 = arith.addf %34, %40 : vector<8x1xf32>
    %cst_15 = arith.constant dense<0.000000e+00> : vector<8xf32>
    %42 = vector.multi_reduction <add>, %41, %cst_15 [1] : vector<8x1xf32> to vector<8xf32>
    %43 = vector.shape_cast %42 : vector<8xf32> to vector<8x1xf32>
    %cst_16 = arith.constant dense<0.000000e+00> : vector<1xf32>
    %44 = vector.multi_reduction <add>, %43, %cst_16 [0] : vector<8x1xf32> to vector<1xf32>
    %45 = vector.shape_cast %44 : vector<1xf32> to vector<1x1xf32>
    %46 = arith.subf %45, %32 : vector<1x1xf32>
    %cst_17 = arith.constant 8.000000e+00 : f32
    %47 = vector.broadcast %cst_17 : f32 to vector<1x1xf32>
    %48 = arith.divf %46, %47 : vector<1x1xf32>
    %cst_18 = arith.constant dense<0xFF800000> : vector<8xf32>
    %49 = vector.multi_reduction <maximumf>, %23, %cst_18 [1] : vector<8x8xf32> to vector<8xf32>
    %50 = vector.shape_cast %49 : vector<8xf32> to vector<8x1xf32>
    %51 = vector.broadcast %50 : vector<8x1xf32> to vector<8x8xf32>
    %52 = arith.subf %23, %51 : vector<8x8xf32>
    %53 = math.exp %52 : vector<8x8xf32>
    %cst_19 = arith.constant dense<0.000000e+00> : vector<8xf32>
    %54 = vector.multi_reduction <add>, %53, %cst_19 [1] : vector<8x8xf32> to vector<8xf32>
    %55 = vector.shape_cast %54 : vector<8xf32> to vector<8x1xf32>
    %56 = math.log %55 : vector<8x1xf32>
    %57 = arith.addf %50, %56 : vector<8x1xf32>
    %cst_20 = arith.constant dense<0.000000e+00> : vector<8xf32>
    %58 = vector.multi_reduction <add>, %57, %cst_20 [1] : vector<8x1xf32> to vector<8xf32>
    %59 = vector.shape_cast %58 : vector<8xf32> to vector<8x1xf32>
    %cst_21 = arith.constant dense<0.000000e+00> : vector<1xf32>
    %60 = vector.multi_reduction <add>, %59, %cst_21 [0] : vector<8x1xf32> to vector<1xf32>
    %61 = vector.shape_cast %60 : vector<1xf32> to vector<1x1xf32>
    %62 = arith.subf %61, %32 : vector<1x1xf32>
    %cst_22 = arith.constant 8.000000e+00 : f32
    %63 = vector.broadcast %cst_22 : f32 to vector<1x1xf32>
    %64 = arith.divf %62, %63 : vector<1x1xf32>
    %65 = arith.addf %48, %64 : vector<1x1xf32>
    %cst_23 = arith.constant 5.000000e-01 : f32
    %66 = vector.broadcast %cst_23 : f32 to vector<1x1xf32>
    %67 = arith.mulf %66, %65 : vector<1x1xf32>
    %c0_24 = arith.constant 0 : index
    %c0_25 = arith.constant 0 : index
    %68 = vector.load %arg6[%c0_24, %c0_25] : memref<1x1xf32, #tpu.memory_space<vmem>>, vector<1x1xf32>
    tpu.vector_store %arg6[%c0_24, %c0_25], %67 {strides = array<i32>} : memref<1x1xf32, #tpu.memory_space<vmem>>, vector<1x1xf32>,
    %c0_26 = arith.constant 0 : index
    %c0_27 = arith.constant 0 : index
    %69 = vector.load %arg3[%c0_26, %c0_27] : memref<2x32xf32, #tpu.memory_space<vmem>>, vector<2x32xf32>
    %c0_28 = arith.constant 0 : index
    %c0_29 = arith.constant 0 : index
    %70 = vector.load %arg4[%c0_28, %c0_29] : memref<2x32xf32, #tpu.memory_space<vmem>>, vector<2x32xf32>
    %c0_30 = arith.constant 0 : index
    %c0_31 = arith.constant 0 : index
    %71 = vector.load %arg5[%c0_30, %c0_31] : memref<1x2xf32, #tpu.memory_space<vmem>>, vector<1x2xf32>
    %72 = vector.extract_strided_slice %69 {offsets = [0, 0], sizes = [1, 32], strides = [1, 1]} : vector<2x32xf32> to vector<1x32xf32>
    %73 = vector.broadcast %72 : vector<1x32xf32> to vector<8x32xf32>
    %74 = arith.mulf %9, %73 : vector<8x32xf32>
    %cst_32 = arith.constant dense<0.000000e+00> : vector<8xf32>
    %75 = vector.multi_reduction <add>, %74, %cst_32 [1] : vector<8x32xf32> to vector<8xf32>
    %76 = vector.shape_cast %75 : vector<8xf32> to vector<8x1xf32>
    %77 = vector.extract_strided_slice %70 {offsets = [0, 0], sizes = [1, 32], strides = [1, 1]} : vector<2x32xf32> to vector<1x32xf32>
    %78 = vector.broadcast %77 : vector<1x32xf32> to vector<8x32xf32>
    %79 = arith.mulf %17, %78 : vector<8x32xf32>
    %cst_33 = arith.constant dense<0.000000e+00> : vector<8xf32>
    %80 = vector.multi_reduction <add>, %79, %cst_33 [1] : vector<8x32xf32> to vector<8xf32>
    %81 = vector.shape_cast %80 : vector<8xf32> to vector<8x1xf32>
    %82 = arith.addf %76, %81 : vector<8x1xf32>
    %83 = vector.extract_strided_slice %71 {offsets = [0, 0], sizes = [1, 1], strides = [1, 1]} : vector<1x2xf32> to vector<1x1xf32>
    %84 = vector.broadcast %83 : vector<1x1xf32> to vector<8x1xf32>
    %85 = arith.addf %82, %84 : vector<8x1xf32>
    %86 = vector.extract_strided_slice %69 {offsets = [1, 0], sizes = [1, 32], strides = [1, 1]} : vector<2x32xf32> to vector<1x32xf32>
    %87 = vector.broadcast %86 : vector<1x32xf32> to vector<8x32xf32>
    %88 = arith.mulf %9, %87 : vector<8x32xf32>
    %cst_34 = arith.constant dense<0.000000e+00> : vector<8xf32>
    %89 = vector.multi_reduction <add>, %88, %cst_34 [1] : vector<8x32xf32> to vector<8xf32>
    %90 = vector.shape_cast %89 : vector<8xf32> to vector<8x1xf32>
    %91 = vector.extract_strided_slice %70 {offsets = [1, 0], sizes = [1, 32], strides = [1, 1]} : vector<2x32xf32> to vector<1x32xf32>
    %92 = vector.broadcast %91 : vector<1x32xf32> to vector<8x32xf32>
    %93 = arith.mulf %17, %92 : vector<8x32xf32>
    %cst_35 = arith.constant dense<0.000000e+00> : vector<8xf32>
    %94 = vector.multi_reduction <add>, %93, %cst_35 [1] : vector<8x32xf32> to vector<8xf32>
    %95 = vector.shape_cast %94 : vector<8xf32> to vector<8x1xf32>
    %96 = arith.addf %90, %95 : vector<8x1xf32>
    %97 = vector.extract_strided_slice %71 {offsets = [0, 1], sizes = [1, 1], strides = [1, 1]} : vector<1x2xf32> to vector<1x1xf32>
    %98 = vector.broadcast %97 : vector<1x1xf32> to vector<8x1xf32>
    %99 = arith.addf %96, %98 : vector<8x1xf32>
    %100 = arith.maximumf %85, %99 : vector<8x1xf32>
    %101 = arith.subf %85, %100 : vector<8x1xf32>
    %102 = math.exp %101 : vector<8x1xf32>
    %103 = arith.subf %99, %100 : vector<8x1xf32>
    %104 = math.exp %103 : vector<8x1xf32>
    %105 = arith.addf %102, %104 : vector<8x1xf32>
    %106 = math.log %105 : vector<8x1xf32>
    %107 = arith.addf %100, %106 : vector<8x1xf32>
    %108 = arith.subf %107, %99 : vector<8x1xf32>
    %cst_36 = arith.constant dense<0.000000e+00> : vector<8xf32>
    %109 = vector.multi_reduction <add>, %108, %cst_36 [1] : vector<8x1xf32> to vector<8xf32>
    %110 = vector.shape_cast %109 : vector<8xf32> to vector<8x1xf32>
    %cst_37 = arith.constant dense<0.000000e+00> : vector<1xf32>
    %111 = vector.multi_reduction <add>, %110, %cst_37 [0] : vector<8x1xf32> to vector<1xf32>
    %112 = vector.shape_cast %111 : vector<1xf32> to vector<1x1xf32>
    %cst_38 = arith.constant 8.000000e+00 : f32
    %113 = vector.broadcast %cst_38 : f32 to vector<1x1xf32>
    %114 = arith.divf %112, %113 : vector<1x1xf32>
    %c0_39 = arith.constant 0 : index
    %c0_40 = arith.constant 0 : index
    %115 = vector.load %arg7[%c0_39, %c0_40] : memref<1x1xf32, #tpu.memory_space<vmem>>, vector<1x1xf32>
    tpu.vector_store %arg7[%c0_39, %c0_40], %114 {strides = array<i32>} : memref<1x1xf32, #tpu.memory_space<vmem>>, vector<1x1xf32>,
    return
  }
  func.func @transform_0(%arg0: i32) -> (i32, i32) {
    %c0_i32 = arith.constant 0 : i32
    %c0_i32_0 = arith.constant 0 : i32
    %c0_i32_1 = arith.constant 0 : i32
    return %c0_i32, %c0_i32_0 : i32, i32
  }
  func.func @transform_1(%arg0: i32) -> (i32, i32) {
    %c0_i32 = arith.constant 0 : i32
    %c0_i32_0 = arith.constant 0 : i32
    %c0_i32_1 = arith.constant 0 : i32
    return %c0_i32, %c0_i32_0 : i32, i32
  }
  func.func @transform_2(%arg0: i32) -> (i32, i32) {
    %c0_i32 = arith.constant 0 : i32
    %c0_i32_0 = arith.constant 0 : i32
    %c0_i32_1 = arith.constant 0 : i32
    return %c0_i32, %c0_i32_0 : i32, i32
  }
  func.func @transform_3(%arg0: i32) -> (i32, i32) {
    %c0_i32 = arith.constant 0 : i32
    %c0_i32_0 = arith.constant 0 : i32
    %c0_i32_1 = arith.constant 0 : i32
    return %c0_i32, %c0_i32_0 : i32, i32
  }
  func.func @transform_4(%arg0: i32) -> (i32, i32) {
    %c0_i32 = arith.constant 0 : i32
    %c0_i32_0 = arith.constant 0 : i32
    %c0_i32_1 = arith.constant 0 : i32
    return %c0_i32, %c0_i32_0 : i32, i32
  }
  func.func @transform_5(%arg0: i32) -> (i32, i32) {
    %c0_i32 = arith.constant 0 : i32
    %c0_i32_0 = arith.constant 0 : i32
    %c0_i32_1 = arith.constant 0 : i32
    return %c0_i32, %c0_i32_0 : i32, i32
  }
  func.func @transform_6(%arg0: i32) -> (i32, i32) {
    %c0_i32 = arith.constant 0 : i32
    %c0_i32_0 = arith.constant 0 : i32
    %c0_i32_1 = arith.constant 0 : i32
    return %c0_i32, %c0_i32_0 : i32, i32
  }
}

module attributes {stable_mosaic.version = 11 : i64} {
  func.func @_itg_kernel(%arg0: i32, %arg1: i32, %arg2: memref<32x64xf32, #tpu.memory_space<vmem>>, %arg3: memref<32x1xi32, #tpu.memory_space<vmem>>, %arg4: memref<8x128xf32, #tpu.memory_space<vmem>>, %arg5: memref<32x1xf32, #tpu.memory_space<vmem>>, %arg6: memref<32x1xf32, #tpu.memory_space<vmem>>, %arg7: memref<32x1xf32, #tpu.memory_space<vmem>>) attributes {dimension_semantics = [#tpu.dimension_semantics<parallel>, #tpu.dimension_semantics<arbitrary>], iteration_bounds = array<i64: 2, 1>, scalar_prefetch = 0 : i64, scratch_operands = 3 : i64, tpu.core_type = #tpu.core_type<tc>, window_params = [{transform_indices = @transform_0, window_bounds = array<i64: 32, 64>}, {transform_indices = @transform_1, window_bounds = array<i64: 32, 1>}, {transform_indices = @transform_2, window_bounds = array<i64: 8, 128>}]} {
    %c0_i32 = arith.constant 0 : i32
    %0 = arith.cmpi eq, %arg1, %c0_i32 : i32
    %1 = arith.extui %0 : i1 to i32
    %c0_i32_0 = arith.constant 0 : i32
    %2 = arith.cmpi ne, %1, %c0_i32_0 : i32
    scf.if %2 {
      %cst_21 = arith.constant -1.000000e+30 : f32
      %37 = vector.broadcast %cst_21 : f32 to vector<32x1xf32>
      %c0_22 = arith.constant 0 : index
      %c0_23 = arith.constant 0 : index
      %38 = vector.load %arg5[%c0_22, %c0_23] : memref<32x1xf32, #tpu.memory_space<vmem>>, vector<32x1xf32>
      tpu.vector_store %arg5[%c0_22, %c0_23], %37 {strides = array<i32>} : memref<32x1xf32, #tpu.memory_space<vmem>>, vector<32x1xf32>,
      %cst_24 = arith.constant 0.000000e+00 : f32
      %39 = vector.broadcast %cst_24 : f32 to vector<32x1xf32>
      %c0_25 = arith.constant 0 : index
      %c0_26 = arith.constant 0 : index
      %40 = vector.load %arg6[%c0_25, %c0_26] : memref<32x1xf32, #tpu.memory_space<vmem>>, vector<32x1xf32>
      tpu.vector_store %arg6[%c0_25, %c0_26], %39 {strides = array<i32>} : memref<32x1xf32, #tpu.memory_space<vmem>>, vector<32x1xf32>,
      %cst_27 = arith.constant 0.000000e+00 : f32
      %41 = vector.broadcast %cst_27 : f32 to vector<32x1xf32>
      %c0_28 = arith.constant 0 : index
      %c0_29 = arith.constant 0 : index
      %42 = vector.load %arg7[%c0_28, %c0_29] : memref<32x1xf32, #tpu.memory_space<vmem>>, vector<32x1xf32>
      tpu.vector_store %arg7[%c0_28, %c0_29], %41 {strides = array<i32>} : memref<32x1xf32, #tpu.memory_space<vmem>>, vector<32x1xf32>,
    } else {
    }
    %c0 = arith.constant 0 : index
    %c0_1 = arith.constant 0 : index
    %3 = vector.load %arg2[%c0, %c0_1] : memref<32x64xf32, #tpu.memory_space<vmem>>, vector<32x64xf32>
    %4 = tpu.iota {dimensions = array<i32: 1>} : vector<32x64xi32>
    %c0_2 = arith.constant 0 : index
    %c0_3 = arith.constant 0 : index
    %5 = vector.load %arg3[%c0_2, %c0_3] : memref<32x1xi32, #tpu.memory_space<vmem>>, vector<32x1xi32>
    %c64_i32 = arith.constant 64 : i32
    %6 = arith.muli %arg1, %c64_i32 : i32
    %7 = vector.broadcast %6 : i32 to vector<32x1xi32>
    %8 = arith.subi %5, %7 : vector<32x1xi32>
    %c0_4 = arith.constant 0 : index
    %c0_5 = arith.constant 0 : index
    %9 = vector.load %arg7[%c0_4, %c0_5] : memref<32x1xf32, #tpu.memory_space<vmem>>, vector<32x1xf32>
    %10 = vector.broadcast %8 : vector<32x1xi32> to vector<32x64xi32>
    %11 = arith.cmpi eq, %4, %10 : vector<32x64xi32>
    %cst = arith.constant 0.000000e+00 : f32
    %12 = vector.broadcast %cst : f32 to vector<32x64xf32>
    %13 = arith.select %11, %3, %12 : vector<32x64xi1>, vector<32x64xf32>
    %cst_6 = arith.constant dense<0.000000e+00> : vector<32xf32>
    %14 = vector.multi_reduction <add>, %13, %cst_6 [1] : vector<32x64xf32> to vector<32xf32>
    %15 = vector.shape_cast %14 : vector<32xf32> to vector<32x1xf32>
    %16 = arith.addf %9, %15 : vector<32x1xf32>
    %c0_7 = arith.constant 0 : index
    %c0_8 = arith.constant 0 : index
    %17 = vector.load %arg7[%c0_7, %c0_8] : memref<32x1xf32, #tpu.memory_space<vmem>>, vector<32x1xf32>
    tpu.vector_store %arg7[%c0_7, %c0_8], %16 {strides = array<i32>} : memref<32x1xf32, #tpu.memory_space<vmem>>, vector<32x1xf32>,
    %c0_9 = arith.constant 0 : index
    %c0_10 = arith.constant 0 : index
    %18 = vector.load %arg5[%c0_9, %c0_10] : memref<32x1xf32, #tpu.memory_space<vmem>>, vector<32x1xf32>
    %cst_11 = arith.constant dense<0xFF800000> : vector<32xf32>
    %19 = vector.multi_reduction <maximumf>, %3, %cst_11 [1] : vector<32x64xf32> to vector<32xf32>
    %20 = vector.shape_cast %19 : vector<32xf32> to vector<32x1xf32>
    %21 = arith.maximumf %18, %20 : vector<32x1xf32>
    %22 = vector.broadcast %21 : vector<32x1xf32> to vector<32x64xf32>
    %23 = arith.subf %3, %22 : vector<32x64xf32>
    %24 = math.exp %23 : vector<32x64xf32>
    %c0_12 = arith.constant 0 : index
    %c0_13 = arith.constant 0 : index
    %25 = vector.load %arg6[%c0_12, %c0_13] : memref<32x1xf32, #tpu.memory_space<vmem>>, vector<32x1xf32>
    %26 = arith.subf %18, %21 : vector<32x1xf32>
    %27 = math.exp %26 : vector<32x1xf32>
    %28 = arith.mulf %25, %27 : vector<32x1xf32>
    %cst_14 = arith.constant dense<0.000000e+00> : vector<32xf32>
    %29 = vector.multi_reduction <add>, %24, %cst_14 [1] : vector<32x64xf32> to vector<32xf32>
    %30 = vector.shape_cast %29 : vector<32xf32> to vector<32x1xf32>
    %31 = arith.addf %28, %30 : vector<32x1xf32>
    %c0_15 = arith.constant 0 : index
    %c0_16 = arith.constant 0 : index
    %32 = vector.load %arg6[%c0_15, %c0_16] : memref<32x1xf32, #tpu.memory_space<vmem>>, vector<32x1xf32>
    tpu.vector_store %arg6[%c0_15, %c0_16], %31 {strides = array<i32>} : memref<32x1xf32, #tpu.memory_space<vmem>>, vector<32x1xf32>,
    %c0_17 = arith.constant 0 : index
    %c0_18 = arith.constant 0 : index
    %33 = vector.load %arg5[%c0_17, %c0_18] : memref<32x1xf32, #tpu.memory_space<vmem>>, vector<32x1xf32>
    tpu.vector_store %arg5[%c0_17, %c0_18], %21 {strides = array<i32>} : memref<32x1xf32, #tpu.memory_space<vmem>>, vector<32x1xf32>,
    %c0_i32_19 = arith.constant 0 : i32
    %34 = arith.cmpi eq, %arg1, %c0_i32_19 : i32
    %35 = arith.extui %34 : i1 to i32
    %c0_i32_20 = arith.constant 0 : i32
    %36 = arith.cmpi ne, %35, %c0_i32_20 : i32
    scf.if %36 {
      %c0_21 = arith.constant 0 : index
      %c0_22 = arith.constant 0 : index
      %37 = vector.load %arg5[%c0_21, %c0_22] : memref<32x1xf32, #tpu.memory_space<vmem>>, vector<32x1xf32>
      %c0_23 = arith.constant 0 : index
      %c0_24 = arith.constant 0 : index
      %38 = vector.load %arg6[%c0_23, %c0_24] : memref<32x1xf32, #tpu.memory_space<vmem>>, vector<32x1xf32>
      %39 = math.log %38 : vector<32x1xf32>
      %40 = arith.addf %37, %39 : vector<32x1xf32>
      %41 = tpu.iota {dimensions = array<i32: 0>} : vector<32x1xi32>
      %c32_i32 = arith.constant 32 : i32
      %42 = arith.muli %arg0, %c32_i32 : i32
      %43 = vector.broadcast %42 : i32 to vector<32x1xi32>
      %44 = arith.addi %41, %43 : vector<32x1xi32>
      %c0_25 = arith.constant 0 : index
      %c0_26 = arith.constant 0 : index
      %45 = vector.load %arg3[%c0_25, %c0_26] : memref<32x1xi32, #tpu.memory_space<vmem>>, vector<32x1xi32>
      %c0_i32_27 = arith.constant 0 : i32
      %46 = vector.broadcast %c0_i32_27 : i32 to vector<32x1xi32>
      %47 = arith.cmpi sge, %45, %46 : vector<32x1xi32>
      %c64_i32_28 = arith.constant 64 : i32
      %48 = vector.broadcast %c64_i32_28 : i32 to vector<32x1xi32>
      %49 = arith.cmpi slt, %44, %48 : vector<32x1xi32>
      %50 = arith.andi %47, %49 : vector<32x1xi1>
      %c0_29 = arith.constant 0 : index
      %c0_30 = arith.constant 0 : index
      %51 = vector.load %arg7[%c0_29, %c0_30] : memref<32x1xf32, #tpu.memory_space<vmem>>, vector<32x1xf32>
      %52 = arith.subf %40, %51 : vector<32x1xf32>
      %cst_31 = arith.constant 0.000000e+00 : f32
      %53 = vector.broadcast %cst_31 : f32 to vector<32x1xf32>
      %54 = arith.select %50, %52, %53 : vector<32x1xi1>, vector<32x1xf32>
      %cst_32 = arith.constant dense<0.000000e+00> : vector<32xf32>
      %55 = vector.multi_reduction <add>, %54, %cst_32 [1] : vector<32x1xf32> to vector<32xf32>
      %56 = vector.shape_cast %55 : vector<32xf32> to vector<32x1xf32>
      %cst_33 = arith.constant dense<0.000000e+00> : vector<1xf32>
      %57 = vector.multi_reduction <add>, %56, %cst_33 [0] : vector<32x1xf32> to vector<1xf32>
      %58 = vector.shape_cast %57 : vector<1xf32> to vector<1x1xf32>
      %59 = vector.shape_cast %58 : vector<1x1xf32> to vector<1x1xf32>
      %60 = vector.broadcast %59 : vector<1x1xf32> to vector<8x128xf32>
      %c0_34 = arith.constant 0 : index
      %c0_35 = arith.constant 0 : index
      %61 = vector.load %arg4[%c0_34, %c0_35] : memref<8x128xf32, #tpu.memory_space<vmem>>, vector<8x128xf32>
      tpu.vector_store %arg4[%c0_34, %c0_35], %60 {strides = array<i32>} : memref<8x128xf32, #tpu.memory_space<vmem>>, vector<8x128xf32>,
    } else {
    }
    return
  }
  func.func @transform_0(%arg0: i32, %arg1: i32) -> (i32, i32) {
    %c0_i32 = arith.constant 0 : i32
    return %arg0, %arg1 : i32, i32
  }
  func.func @transform_1(%arg0: i32, %arg1: i32) -> (i32, i32) {
    %c0_i32 = arith.constant 0 : i32
    %c0_i32_0 = arith.constant 0 : i32
    return %arg0, %c0_i32 : i32, i32
  }
  func.func @transform_2(%arg0: i32, %arg1: i32) -> (i32, i32) {
    %c0_i32 = arith.constant 0 : i32
    %c0_i32_0 = arith.constant 0 : i32
    return %arg0, %c0_i32 : i32, i32
  }
}

</mosaic_0001>

<bundles_post_ra>
// kernel: multimodal_it_loss.3
= control target key start
LH: loop header
LB: loop body
LE: loop exit
PB: predicated region body
PF: predicated region fallthrough
CT: control target
= control target key end

     0   :  { %s633_s9 = smov 0   ;;  %s635_s10 = smov 0   ;;  %s810_s0 = inlined_call_operand.vmem [shape: f32[64,64], index: 0, kind: input, shape index: {}]   ;;  %s811_s1 = inlined_call_operand.vmem [shape: s32[64,1], index: 1, kind: input, shape index: {}]   ;;  %s812_s2 = inlined_call_operand.vmem [shape: f32[16,128], index: 2, kind: output, shape index: {}]  }
   0x1   :  { %s637_s11 = smov 0  }
   0x2 LB: > { %s24_s12 = sadd.s32 1, %s609_s10  ;;  %p529_p0 = scmp.ge.s32.totalorder %s613_s11, 1  ;;  %s613_s11 = sphi %s637_s11, %s12_s11   ;;  %s609_s10 = sphi %s635_s10, %s814_s10   ;;  %s605_s9 = sphi %s633_s9, %s813_s9  }
   0x3   : > { %p26_p1 = scmp.ge.s32.totalorder %s24_s12, 2  ;;  %p141_p2 = scmp.lt.s32.totalorder %s613_s11, 3 }
   0x5   : > { %s816_s12 = smov (%p26_p1, %s24_s12), 0  ;;  %p142_p3 = pnand %p529_p0, %p141_p2 }
   0x6   : > { %s530_s13 = sshll.u32 (!%p142_p3), %s605_s9, 2  ;;  %s535_s21 = sshll.u32 (!%p142_p3), %s605_s9, 5 }
   0x7   : > { %145 = sbr.rel (%p142_p3) target bundleno = 621 (0x26d), region = 28  ;;  %p171_p4 = scmp.lt.s32.totalorder (!%p142_p3), %s530_s13, 7 }
   0x8   : > { %p185_p5 = scmp.lt.s32.totalorder (!%p142_p3), %s605_s9, 1 }
   0xc   : > { %vm193_vm0 = vcmask 7168   ;;  %v615_v0 = vmov -1e+30   ;;  %s818_s13 = smov (!%p171_p4, %s530_s13), 7  ;;  %vm246_vm1 = vcmask 523264   ;;  %v616_v9 = vmov 0  }
   0xd   : > { %194 = vst.msk [vmem:[#allocation2] sm:$0xff] %vm193_vm0, %v615_v0  ;;  %195 = vst.msk [vmem:[#allocation2 + $0x8] sm:$0xff] %vm193_vm0, %v615_v0  ;;  %s531_s14 = sshll.u32 %s818_s13, 3  ;;  %565 = vset.pattern.permute.xlu0 %v616_v9  ;;  %566 = vset.pattern.permute.xlu1 %v616_v9  ;;  %v617_v10 = vmov 0.0   ;;  %v210_v44 = vlaneseq  ;;  %s820_s9 = smov (!%p185_p5, %s605_s9), 1 }
   0xe   : > { %196 = vst.msk [vmem:[#allocation2 + $0x10] sm:$0xff] %vm193_vm0, %v615_v0  ;;  %197 = vst.msk [vmem:[#allocation2 + $0x18] sm:$0xff] %vm193_vm0, %v615_v0  ;;  %s177_s17 = scalar_lea.vmem %s810_s0, %s531_s14  ;;  %s183_s20 = scalar_lea.vmem %s811_s1, %s531_s14 }
   0xf   : > { %v666_v1 = vld [vmem:[%s177_s17] sm:$0xff]  ;;  %v668_v2 = vld [vmem:[%s177_s17 + $0x8] sm:$0xff]  ;;  %v670_v3 = vld [vmem:[%s177_s17 + $0x10] sm:$0xff]  ;;  %198 = vst.msk [vmem:[#allocation3] sm:$0xff] %vm193_vm0, %v617_v10  ;;  %v211_v48 = vand.u32 127, %v210_v44  ;;  %s534_s22 = sshll.u32 %s820_s9, 3 }
  0x10   : > { %v272_v4 = vsel %vm246_vm1, %v666_v1, -inf  ;;  %v278_v5 = vsel %vm246_vm1, %v670_v3, -inf  ;;  %v676_v6 = vld [vmem:[%s177_s17 + $0x18] sm:$0xff]  ;;  %v275_v7 = vsel %vm246_vm1, %v668_v2, -inf  ;;  %199 = vst.msk [vmem:[#allocation3 + $0x8] sm:$0xff] %vm193_vm0, %v617_v10  ;;  %200 = vst.msk [vmem:[#allocation3 + $0x10] sm:$0xff] %vm193_vm0, %v617_v10  ;;  %s188_s25 = scalar_lea.vmem %s812_s2, %s534_s22 }
  0x11   : > { %273 = vmax.xlane.f32.xlu0 %v272_v4  ;;  %279 = vmax.xlane.f32.xlu1 %v278_v5  ;;  %v281_v8 = vsel %vm246_vm1, %v676_v6, -inf  ;;  %201 = vst.msk [vmem:[#allocation3 + $0x18] sm:$0xff] %vm193_vm0, %v617_v10  ;;  %202 = vst.msk [vmem:[#allocation4] sm:$0xff] %vm193_vm0, %v617_v10  ;;  %v735_v27 = vld [vmem:[%s183_s20] sm:$0xff]  ;;  %v738_v28 = vld [vmem:[%s183_s20 + $0x8] sm:$0xff] }
  0x12   : > { %203 = vst.msk [vmem:[#allocation4 + $0x8] sm:$0xff] %vm193_vm0, %v617_v10  ;;  %204 = vst.msk [vmem:[#allocation4 + $0x10] sm:$0xff] %vm193_vm0, %v617_v10  ;;  %v741_v29 = vld [vmem:[%s183_s20 + $0x10] sm:$0xff]  ;;  %v744_v30 = vld [vmem:[%s183_s20 + $0x18] sm:$0xff]  ;;  %vm403_vm6 = vcmp.ge.s32.totalorder %v738_v28, 0  ;;  %vm402_vm8 = vcmp.ge.s32.totalorder %v735_v27, 0 }
  0x13   : > { %205 = vst.msk [vmem:[#allocation4 + $0x18] sm:$0xff] %vm193_vm0, %v617_v10  ;;  %vm404_vm10 = vcmp.ge.s32.totalorder %v741_v29, 0  ;;  %vm405_vm14 = vcmp.ge.s32.totalorder %v744_v30, 0 }
  0x14   : > { %v690_v11 = vld [vmem:[#allocation2] sm:$0xff]  ;;  %v700_v17 = vld [vmem:[#allocation2 + $0x8] sm:$0xff] }
  0x15   : > { %276 = vmax.xlane.f32.xlu0 %v275_v7  ;;  %282 = vmax.xlane.f32.xlu1 %v281_v8  ;;  %v692_v12 = vld [vmem:[#allocation2 + $0x10] sm:$0xff]  ;;  %v702_v18 = vld [vmem:[#allocation2 + $0x18] sm:$0xff] }
  0x17   : > { %v321_v10 = vld [vmem:[#allocation3 + $0x8] sm:$0xff] }
  0x9a   : > { %v274_v13 = vpop.xlane.xlu0 %273  ;;  %v280_v14 = vpop.xlane.xlu1 %279 }
  0x9b   : > { %v695_v15 = vmax.f32 %v690_v11, %v274_v13  ;;  %v698_v16 = vmax.f32 %v692_v12, %v280_v14 }
  0x9d   : > { %v324_v19 = vsub.f32 %v690_v11, %v695_v15  ;;  %360 = vst.msk [vmem:[#allocation2] sm:$0xff] %vm193_vm0, %v695_v15  ;;  %290 = vperm.xlu0 %565, %v695_v15   ;;  %v326_v20 = vsub.f32 %v692_v12, %v698_v16  ;;  %362 = vst.msk [vmem:[#allocation2 + $0x10] sm:$0xff] %vm193_vm0, %v698_v16  ;;  %v322_v12 = vld [vmem:[#allocation3 + $0x10] sm:$0xff] }
  0x9e   : > { %v277_v21 = vpop.xlane.xlu0 %276  ;;  %v283_v22 = vpop.xlane.xlu1 %282 }
  0x9f   : > { %v714_v23 = vmax.f32 %v700_v17, %v277_v21  ;;  %v717_v24 = vmax.f32 %v702_v18, %v283_v22  ;;  %v222_v22 = vld [vmem:[#allocation4] sm:$0xff] }
  0xa1   : > { %v325_v25 = vsub.f32 %v700_v17, %v714_v23  ;;  %361 = vst.msk [vmem:[#allocation2 + $0x8] sm:$0xff] %vm193_vm0, %v714_v23  ;;  %295 = vperm.xlu1 %566, %v714_v23   ;;  %v327_v26 = vsub.f32 %v702_v18, %v717_v24  ;;  %363 = vst.msk [vmem:[#allocation2 + $0x18] sm:$0xff] %vm193_vm0, %v717_v24 }
  0xa3   : > { %v334_v4 = vmul.f32 1.442695, %v327_v26 }
  0xa5   : > { %300 = vperm.xlu1 %566, %v698_v16  }
  0xa9   : > { %305 = vperm.xlu1 %566, %v717_v24  }
  0xad   : > { %227 = vperm.xlu1 %566, %v735_v27  }
  0xb1   : > { %230 = vperm.xlu1 %566, %v738_v28  }
  0xb5   : > { %233 = vperm.xlu1 %566, %v741_v29  }
  0xb9   : > { %236 = vperm.xlu1 %566, %v744_v30  }
 0x118   : > { %v291_v31 = vpop.permute.xlu0 %290 }
 0x119   : > { %v308_v32 = vsub.f32 %v666_v1, %v291_v31 }
 0x11b   : > { %v312_v33 = vmul.f32 1.442695, %v308_v32 }
 0x11c   : > { %v296_v34 = vpop.permute.xlu1 %295 }
 0x11d   : > { %567 = vpow2.f32 %v312_v33  ;;  %v309_v35 = vsub.f32 %v668_v2, %v296_v34  ;;  %v223_v33 = vld [vmem:[#allocation4 + $0x8] sm:$0xff]  ;;  %v224_v34 = vld [vmem:[#allocation4 + $0x10] sm:$0xff] }
 0x11f   : > { %v314_v36 = vmul.f32 1.442695, %v309_v35 }
 0x120   : > { %v301_v37 = vpop.permute.xlu1 %300 }
 0x121   : > { %569 = vpow2.f32 %v314_v36  ;;  %v310_v38 = vsub.f32 %v670_v3, %v301_v37 }
 0x123   : > { %v316_v39 = vmul.f32 1.442695, %v310_v38 }
 0x124   : > { %v306_v40 = vpop.permute.xlu1 %305 }
 0x125   : > { %571 = vpow2.f32 %v316_v39  ;;  %v311_v41 = vsub.f32 %v676_v6, %v306_v40  ;;  %v225_v40 = vld [vmem:[#allocation4 + $0x18] sm:$0xff] }
 0x127   : > { %v318_v42 = vmul.f32 1.442695, %v311_v41 }
 0x128   : > { %v228_v43 = vpop.permute.xlu1 %227 }
 0x129   : > { %573 = vpow2.f32 %v318_v42  ;;  %vm238_vm2 = vcmp.eq.s32.totalorder %v211_v48, %v228_v43  ;;  %v388_v42 = vshrl.u32 %v210_v44, 7 }
 0x12a   : > { %v568_v45 = vpop.eup %567  ;;  %v242_v54 = vsel %vm238_vm2, %v666_v1, 0.0  ;;  %v328_v1 = vmul.f32 1.442695, %v324_v19 }
 0x12b   : > { %v340_v46 = vsel %vm246_vm1, %v568_v45, 0.0  ;;  %v247_v57 = vsel %vm246_vm1, %v242_v54, 0.0  ;;  %v367_v54 = vld [vmem:[#allocation2] sm:$0xff] }
 0x12c   : > { %v231_v47 = vpop.permute.xlu1 %230  ;;  %341 = vadd.xlane.f32.xlu1 %v340_v46  ;;  %575 = vpow2.f32 %v328_v1  ;;  %v389_v46 = vadd.s32 8, %v388_v42 }
 0x12d   : > { %vm239_vm3 = vcmp.eq.s32.totalorder %v211_v48, %v231_v47 }
 0x12e   : > { %v570_v49 = vpop.eup %569  ;;  %v243_v60 = vsel %vm239_vm3, %v668_v2, 0.0  ;;  %v330_v2 = vmul.f32 1.442695, %v325_v25 }
 0x12f   : > { %v343_v50 = vsel %vm246_vm1, %v570_v49, 0.0  ;;  %v250_v62 = vsel %vm246_vm1, %v243_v60, 0.0  ;;  %v390_v49 = vadd.s32 16, %v388_v42 }
 0x130   : > { %344 = vadd.xlane.f32.xlu0 %v343_v50  ;;  %v234_v51 = vpop.permute.xlu1 %233  ;;  %577 = vpow2.f32 %v330_v2  ;;  %v393_v50 = vstv %s535_s21 }
 0x131   : > { %vm240_vm4 = vcmp.eq.s32.totalorder %v211_v48, %v234_v51 }
 0x132   : > { %v572_v52 = vpop.eup %571  ;;  %v244_v59 = vsel %vm240_vm4, %v670_v3, 0.0  ;;  %v332_v3 = vmul.f32 1.442695, %v326_v20  ;;  %v323_v20 = vld [vmem:[#allocation3 + $0x18] sm:$0xff] }
 0x133   : > { %v346_v53 = vsel %vm246_vm1, %v572_v52, 0.0  ;;  %v253_v61 = vsel %vm246_vm1, %v244_v59, 0.0  ;;  %v395_v52 = vadd.s32 %v393_v50, %v389_v46  ;;  %v368_v59 = vld [vmem:[#allocation2 + $0x8] sm:$0xff] }
 0x134   : > { %347 = vadd.xlane.f32.xlu0 %v346_v53  ;;  %v237_v56 = vpop.permute.xlu1 %236  ;;  %579 = vpow2.f32 %v332_v3  ;;  %v394_v53 = vadd.s32 %v393_v50, %v388_v42  ;;  %v369_v3 = vld [vmem:[#allocation2 + $0x10] sm:$0xff] }
 0x135   : > { %vm241_vm5 = vcmp.eq.s32.totalorder %v211_v48, %v237_v56  ;;  %581 = vpow2.f32 %v334_v4  ;;  %vm407_vm7 = vcmp.lt.s32.totalorder %v395_v52, 64 }
 0x136   : > { %v574_v55 = vpop.eup %573  ;;  %v245_v63 = vsel %vm241_vm5, %v676_v6, 0.0  ;;  %v320_v6 = vld [vmem:[#allocation3] sm:$0xff]  ;;  %vm406_vm9 = vcmp.lt.s32.totalorder %v394_v53, 64  ;;  %vm411_vm12 = vmand %vm403_vm6, %vm407_vm7 }
 0x137   : > { %v349_v58 = vsel %vm246_vm1, %v574_v55, 0.0  ;;  %v256_v0 = vsel %vm246_vm1, %v245_v63, 0.0  ;;  %v396_v55 = vadd.s32 %v393_v50, %v390_v49  ;;  %vm410_vm13 = vmand %vm402_vm8, %vm406_vm9 }
 0x138   : > { %248 = vadd.xlane.f32.xlu0 %v247_v57  ;;  %350 = vadd.xlane.f32.xlu1 %v349_v58  ;;  %v391_v58 = vadd.s32 24, %v388_v42 }
 0x139   : > { %v576_v5 = vpop.eup %575  ;;  %vm408_vm11 = vcmp.lt.s32.totalorder %v396_v55, 64 }
 0x13a   : > { %v336_v7 = vmul.f32 %v576_v5, %v320_v6  ;;  %v397_v1 = vadd.s32 %v393_v50, %v391_v58  ;;  %vm412_vm15 = vmand %vm404_vm10, %vm408_vm11 }
 0x13c   : > { %254 = vadd.xlane.f32.xlu0 %v253_v61  ;;  %251 = vadd.xlane.f32.xlu1 %v250_v62  ;;  %vm409_vm1 = vcmp.lt.s32.totalorder %v397_v1, 64 }
 0x13d   : > { %v578_v8 = vpop.eup %577  ;;  %vm413_vm2 = vmand %vm405_vm14, %vm409_vm1 }
 0x13e   : > { %v337_v13 = vmul.f32 %v578_v8, %v321_v10  ;;  %v370_v10 = vld [vmem:[#allocation2 + $0x18] sm:$0xff] }
 0x140   : > { %257 = vadd.xlane.f32.xlu1 %v256_v0 }
 0x141   : > { %v580_v14 = vpop.eup %579 }
 0x142   : > { %v338_v17 = vmul.f32 %v580_v14, %v322_v12  ;;  %v582_v18 = vpop.eup %581 }
 0x143   : > { %v339_v24 = vmul.f32 %v582_v18, %v323_v20 }
 0x1b5   : > { %v342_v9 = vpop.xlane.xlu1 %341 }
 0x1b6   : > { %v352_v11 = vadd.f32 %v342_v9, %v336_v7 }
 0x1b8   : > { %356 = vst.msk [vmem:[#allocation3] sm:$0xff] %vm193_vm0, %v352_v11 }
 0x1b9   : > { %v345_v15 = vpop.xlane.xlu0 %344 }
 0x1ba   : > { %v353_v16 = vadd.f32 %v345_v15, %v337_v13 }
 0x1bc   : > { %357 = vst.msk [vmem:[#allocation3 + $0x8] sm:$0xff] %vm193_vm0, %v353_v16 }
 0x1bd   : > { %v348_v19 = vpop.xlane.xlu0 %347 }
 0x1be   : > { %v354_v21 = vadd.f32 %v348_v19, %v338_v17 }
 0x1bf   : > { %v371_v23 = vld [vmem:[#allocation3] sm:$0xff] }
 0x1c0   : > { %358 = vst.msk [vmem:[#allocation3 + $0x10] sm:$0xff] %vm193_vm0, %v354_v21  ;;  %583 = vlog2.f32 %v371_v23 }
 0x1c1   : > { %v351_v25 = vpop.xlane.xlu1 %350  ;;  %v249_v26 = vpop.xlane.xlu0 %248 }
 0x1c2   : > { %v355_v31 = vadd.f32 %v351_v25, %v339_v24  ;;  %v259_v32 = vadd.f32 %v249_v26, %v222_v22 }
 0x1c3   : > { %v372_v35 = vld [vmem:[#allocation3 + $0x8] sm:$0xff] }
 0x1c4   : > { %359 = vst.msk [vmem:[#allocation3 + $0x18] sm:$0xff] %vm193_vm0, %v355_v31  ;;  %264 = vst.msk [vmem:[#allocation4] sm:$0xff] %vm193_vm0, %v259_v32  ;;  %585 = vlog2.f32 %v372_v35 }
 0x1c5   : > { %v252_v36 = vpop.xlane.xlu1 %251  ;;  %v255_v37 = vpop.xlane.xlu0 %254 }
 0x1c6   : > { %v260_v38 = vadd.f32 %v252_v36, %v223_v33  ;;  %v261_v39 = vadd.f32 %v255_v37, %v224_v34 }
 0x1c7   : > { %v373_v41 = vld [vmem:[#allocation3 + $0x10] sm:$0xff] }
 0x1c8   : > { %265 = vst.msk [vmem:[#allocation4 + $0x8] sm:$0xff] %vm193_vm0, %v260_v38  ;;  %266 = vst.msk [vmem:[#allocation4 + $0x10] sm:$0xff] %vm193_vm0, %v261_v39  ;;  %587 = vlog2.f32 %v373_v41 }
 0x1c9   : > { %v258_v43 = vpop.xlane.xlu1 %257 }
 0x1ca   : > { %v262_v45 = vadd.f32 %v258_v43, %v225_v40 }
 0x1cb   : > { %v374_v47 = vld [vmem:[#allocation3 + $0x18] sm:$0xff]  ;;  %v414_v62 = vld [vmem:[#allocation4] sm:$0xff] }
 0x1cc   : > { %267 = vst.msk [vmem:[#allocation4 + $0x18] sm:$0xff] %vm193_vm0, %v262_v45  ;;  %589 = vlog2.f32 %v374_v47 }
 0x1cd   : > { %v584_v48 = vpop.eup %583 }
 0x1ce   : > { %v376_v51 = vmul.f32 0.6931472, %v584_v48 }
 0x1cf   : > { %v415_v63 = vld [vmem:[#allocation4 + $0x8] sm:$0xff]  ;;  %v416_v27 = vld [vmem:[#allocation4 + $0x10] sm:$0xff] }
 0x1d0   : > { %v383_v57 = vadd.f32 %v376_v51, %v367_v54 }
 0x1d1   : > { %v586_v44 = vpop.eup %585 }
 0x1d2   : > { %v378_v56 = vmul.f32 0.6931472, %v586_v44  ;;  %v418_v2 = vsub.f32 %v383_v57, %v414_v62 }
 0x1d3   : > { %v417_v15 = vld [vmem:[#allocation4 + $0x18] sm:$0xff] }
 0x1d4   : > { %v384_v60 = vadd.f32 %v378_v56, %v368_v59  ;;  %v422_v9 = vsel %vm410_vm13, %v418_v2, 0.0 }
 0x1d5   : > { %v588_v61 = vpop.eup %587  ;;  %v430_v12 = vsel %vm193_vm0, %v422_v9, 0.0 }
 0x1d6   : > { %v380_v0 = vmul.f32 0.6931472, %v588_v61  ;;  %v419_v28 = vsub.f32 %v384_v60, %v415_v63 }
 0x1d8   : > { %v385_v4 = vadd.f32 %v380_v0, %v369_v3  ;;  %v423_v5 = vsel %vm411_vm12, %v419_v28, 0.0 }
 0x1d9   : > { %v590_v6 = vpop.eup %589  ;;  %v431_v11 = vsel %vm193_vm0, %v423_v5, 0.0 }
 0x1da   : > { %v382_v7 = vmul.f32 0.6931472, %v590_v6  ;;  %v420_v8 = vsub.f32 %v385_v4, %v416_v27  ;;  %v432_v16 = vadd.f32 %v431_v11, %v430_v12 }
 0x1dc   : > { %v386_v13 = vadd.f32 %v382_v7, %v370_v10  ;;  %v424_v14 = vsel %vm412_vm15, %v420_v8, 0.0 }
 0x1dd   : > { %v433_v30 = vsel %vm193_vm0, %v424_v14, 0.0 }
 0x1de   : > { %v421_v29 = vsub.f32 %v386_v13, %v417_v15  ;;  %v434_v18 = vadd.f32 %v433_v30, %v432_v16 }
 0x1e0   : > { %v425_v17 = vsel %vm413_vm2, %v421_v29, 0.0 }
 0x1e1   : > { %v435_v19 = vsel %vm193_vm0, %v425_v17, 0.0 }
 0x1e2   : > { %v436_v20 = vadd.f32 %v435_v19, %v434_v18 }
 0x1e4   : > { %v437_v21 = vrot.slane %v436_v20, 4 }
 0x1e6   : > { %v438_v22 = vadd.f32 %v437_v21, %v436_v20 }
 0x1e8   : > { %v439_v23 = vrot.slane %v438_v22, 2 }
 0x1ea   : > { %v440_v24 = vadd.f32 %v439_v23, %v438_v22 }
 0x1ec   : > { %v441_v25 = vrot.slane %v440_v24, 1 }
 0x1ee   : > { %v442_v26 = vadd.f32 %v441_v25, %v440_v24 }
 0x1f0   : > { %445 = vperm.xlu0 %565, %v442_v26  }
 0x26b   : > { %v446_v31 = vpop.permute.xlu0 %445 }
 0x26c   : > { %448 = vst [vmem:[%s188_s25] sm:$0xff] %v446_v31 }
 0x26d PF: > { %s12_s11 = sadd.s32 1, %s613_s11   ;;  %s813_s9 = smov %s609_s10 }
 0x26e   : > { %p9_p6 = scmp.ge.s32.totalorder %s12_s11, 4   ;;  %s814_s10 = smov %s816_s12 }
 0x270   :  { %11 = sbr.rel (!%p9_p6) target bundleno = 2 (0x2), region = 69 }

// kernel: multimodal_it_loss.2
= control target key start
LH: loop header
LB: loop body
LE: loop exit
PB: predicated region body
PF: predicated region fallthrough
CT: control target
= control target key end

     0   :  { %12 = vsyncpa [#allocation3], 0  ;;  %s600_s0 = inlined_call_operand.vmem [shape: f32[8,32], index: 0, kind: input, shape index: {}]   ;;  %s601_s1 = inlined_call_operand.hbm [shape: f32[8,32], index: 1, kind: input, shape index: {}]   ;;  %s602_s2 = inlined_call_operand.vmem [shape: f32[2,32], index: 2, kind: input, shape index: {}]   ;;  %s603_s3 = inlined_call_operand.vmem [shape: f32[2,32], index: 3, kind: input, shape index: {}]   ;;  %s604_s4 = inlined_call_operand.vmem [shape: f32[1,2], index: 4, kind: input, shape index: {}]   ;;  %s605_s5 = inlined_call_operand.hbm [shape: f32[1,1], index: 5, kind: output, shape index: {0}]   ;;  %s606_s6 = inlined_call_operand.hbm [shape: f32[1,1], index: 6, kind: output, shape index: {1}]  }
   0x1   :  { %13 = vsyncpa [#allocation4], 0 }
   0x2   :  { %14 = vsyncpa [#allocation7], 0  ;;  %s502_s21 = smov [#allocation2]  }
   0x3   :  { %s23_s22 = sshll.u32 %s502_s21, 4  ;;  %s24_s22 = int_to_ptr.vmem [resolvable:$true] %s23_s22 }
   0x4   :  { %s444_s23 = scalar_lea.vmem %s24_s22, 128  ;;  %p449_p1 = scmp.lt.s32.totalorder %s24_s22, %s24_s22 }
   0x5   :  { %p445_p0 = scmp.ne.s32.totalorder %s24_s22, %s444_s23  ;;  %p450_p2 = scmp.lt.s32.totalorder %s444_s23, %s444_s23 }
   0x7   :  { %p451_p3 = por %p450_p2, %p449_p1 }
   0x9   :  { %p452_p4 = pnand %p451_p3, %p445_p0 }
   0xb   :  { %455 = shalt.err (!%p452_p4)
}
   0xc   :  { %26 = dma.hbm_to_vmem [thread:$0]  %s601_s1, 128, %s24_s22, [#allocation3]  }
   0xd   :  { %496 = dma.done.wait [#allocation3], 128  }
   0xe   :  { %497 = vsyncadd [#allocation3], 4294967168  ;;  %v36_v0 = vld [vmem:[%s600_s0] sm:$0xff]  ;;  %vm39_vm0 = vcmask 261120   ;;  %v503_v6 = vmov 0.0   ;;  %vm504_vm1 = vmmov 0   ;;  %v216_v19 = vlaneseq }
   0xf   :  { %v37_v1 = vld [vmem:[#allocation2] sm:$0xff]  ;;  %v38_v2 = vmul.f32 %v36_v0, %v36_v0  ;;  %402 = vmatprep.subr.mxu1 %v503_v6  ;;  %397 = vmatprep.subr.mxu0 %v503_v6  ;;  %s505_s30 = smov 127   ;;  %vm222_vm6 = vcmask 64512   ;;  %vm349_vm8 = vcmask 7168   ;;  %s507_s7 = smov [#allocation5]   ;;  %vm277_vm9 = vcmask 0  }
  0x10   :  { %v53_v3 = vmul.f32 %v37_v1, %v37_v1  ;;  %404 = vmatprep.mubr.msk.f32.mxu1 %vm504_vm1, %v503_v6  ;;  %399 = vmatprep.mubr.msk.f32.mxu0 %vm504_vm1, %v503_v6  ;;  %v553_v22 = vshrl.u32 %v216_v19, 7  ;;  %v279_v25 = vld [vmem:[%s602_s2] sm:$0x3]  ;;  %s365_s8 = sshll.u32 %s507_s7, 4  ;;  %s366_s8 = int_to_ptr.vmem [resolvable:$true] %s365_s8 }
  0x11   :  { %v40_v4 = vsel %vm39_vm0, %v38_v2, 0.0  ;;  %v280_v29 = vld [vmem:[%s603_s3] sm:$0x3]  ;;  %s456_s9 = scalar_lea.vmem %s366_s8, 16  ;;  %s460_s10 = scalar_lea.vmem %s366_s8, 32 }
  0x12   :  { %41 = vadd.xlane.f32.xlu0 %v40_v4  ;;  %v54_v5 = vsel %vm39_vm0, %v53_v3, 0.0  ;;  %v308_v23 = vsub.s32 1, %v553_v22  ;;  %v284_v24 = vsub.s32 0, %v553_v22  ;;  %v392_v44 = vld [vmem:[%s604_s4] ss:$0 sm:$0xff]  ;;  %s506_s4 = smov 1   ;;  %p457_p5 = scmp.ne.s32.totalorder %s366_s8, %s456_s9 }
  0x13   :  { %v219_v4 = vand.u32 127, %v216_v19  ;;  %p461_p6 = scmp.lt.s32.totalorder %s366_s8, %s366_s8  ;;  %p462_p7 = scmp.lt.s32.totalorder %s460_s10, %s456_s9 }
  0x14   :  { %v309_v26 = vrot.slane %v279_v25, %v308_v23  ;;  %v285_v27 = vrot.slane %v279_v25, %v284_v24  ;;  %v317_v33 = vrot.slane %v280_v29, %v308_v23  ;;  %v293_v38 = vrot.slane %v280_v29, %v284_v24 }
  0x15   :  { %vm220_vm7 = vcmp.eq.s32.totalorder %v553_v22, %v219_v4  ;;  %p463_p8 = por %p462_p7, %p461_p6 }
  0x16   :  { %55 = vadd.xlane.f32.xlu0 %v54_v5 }
  0x17   :  { %p464_p9 = pnand %p463_p8, %p457_p5 }
  0x9b   :  { %v42_v7 = vpop.xlane.xlu0 %41 }
  0x9c   :  { %414 = vrsqrt.f32 %v42_v7  ;;  %vm45_vm2 = vcmp.eq.f32.partialorder %v42_v7, inf  ;;  %v48_v11 = vand.u32 2147483648, %v42_v7  ;;  %vm47_vm3 = vcmp.eq.f32.partialorder %v42_v7, 0.0 }
  0x9f   :  { %v56_v8 = vpop.xlane.xlu0 %55 }
  0xa0   :  { %416 = vrsqrt.f32 %v56_v8  ;;  %vm59_vm4 = vcmp.eq.f32.partialorder %v56_v8, inf  ;;  %v62_v17 = vand.u32 2147483648, %v56_v8  ;;  %vm61_vm5 = vcmp.eq.f32.partialorder %v56_v8, 0.0 }
  0xa9   :  { %v415_v9 = vpop.eup %414 }
  0xaa   :  { %v44_v10 = vmul.f32 %v415_v9, %v42_v7 }
  0xac   :  { %v46_v12 = vsel %vm45_vm2, %v42_v7, %v44_v10 }
  0xad   :  { %v417_v13 = vpop.eup %416  ;;  %v49_v14 = vsel %vm47_vm3, %v48_v11, %v46_v12 }
  0xae   :  { %v50_v15 = vmax.f32 %v49_v14, 1e-12  ;;  %v58_v16 = vmul.f32 %v417_v13, %v56_v8 }
  0xb0   :  { %418 = vrcp.f32 %v50_v15  ;;  %v60_v18 = vsel %vm59_vm4, %v56_v8, %v58_v16 }
  0xb1   :  { %v63_v20 = vsel %vm61_vm5, %v62_v17, %v60_v18 }
  0xb2   :  { %v64_v21 = vmax.f32 %v63_v20, 1e-12 }
  0xb4   :  { %420 = vrcp.f32 %v64_v21 }
  0xbd   :  { %v419_v28 = vpop.eup %418 }
  0xbe   :  { %v52_v30 = vmul.f32 %v419_v28, %v36_v0 }
  0xc0   :  { %403 = vmatpush3.xpose.msk.msra.mxu1 %vm39_vm0, %v52_v30  ;;  %v310_v31 = vmul.f32 %v309_v26, %v52_v30  ;;  %v286_v32 = vmul.f32 %v285_v27, %v52_v30 }
  0xc1   :  { %v421_v34 = vpop.eup %420 }
  0xc2   :  { %v311_v35 = vsel %vm39_vm0, %v310_v31, 0.0  ;;  %v287_v36 = vsel %vm39_vm0, %v286_v32, 0.0  ;;  %v66_v37 = vmul.f32 %v421_v34, %v37_v1 }
  0xc3   :  { %312 = vadd.xlane.f32.xlu1 %v311_v35  ;;  %288 = vadd.xlane.f32.xlu0 %v287_v36 }
  0xc4   :  { %398 = vmatpush3.xpose.msk.msra.mxu0 %vm39_vm0, %v66_v37  ;;  %405 = vmatmul.mubr.msk.f32.vlgmr.msra.gmra.mxu1 %vm39_vm0, %v66_v37  ;;  %v318_v39 = vmul.f32 %v317_v33, %v66_v37  ;;  %v294_v41 = vmul.f32 %v293_v38, %v66_v37 }
  0xc6   :  { %v319_v40 = vsel %vm39_vm0, %v318_v39, 0.0  ;;  %v295_v42 = vsel %vm39_vm0, %v294_v41, 0.0 }
  0xc7   :  { %320 = vadd.xlane.f32.xlu1 %v319_v40  ;;  %400 = vmatmul.mubr.msk.f32.vlgmr.msra.gmra.mxu0 %vm39_vm0, %v52_v30 }
  0xcb   :  { %296 = vadd.xlane.f32.xlu1 %v295_v42 }
 0x14c   :  { %v313_v43 = vpop.xlane.xlu1 %312  ;;  %v289_v57 = vpop.xlane.xlu0 %288 }
 0x150   :  { %v321_v45 = vpop.xlane.xlu1 %320 }
 0x151   :  { %v322_v46 = vadd.f32 %v321_v45, %v313_v43 }
 0x153   :  { %v323_v47 = vadd.f32 %v392_v44, %v322_v46 }
 0x154   :  { %v297_v56 = vpop.xlane.xlu1 %296 }
 0x155   :  { %325 = vrot.lane.b32.xlu0 %v323_v47, %s505_s30  ;;  %v298_v58 = vadd.f32 %v297_v56, %v289_v57 }
 0x157   :  { %v305_v59 = vadd.f32 %v392_v44, %v298_v58 }
 0x184   :  { %v211_v48 = vpop.f32.mrf.mxu1 }
 0x185   :  { %v215_v53 = vmul.f32 14.285714, %v211_v48 }
 0x186   :  { %v406_v49 = vpop.f32.mrf.mxu1 }
 0x187   :  { %v139_v50 = vpop.f32.mrf.mxu0  ;;  %v254_v55 = vsel %vm222_vm6, %v215_v53, -inf }
 0x188   :  { %v144_v51 = vmul.f32 14.285714, %v139_v50 }
 0x189   :  { %v401_v52 = vpop.f32.mrf.mxu0 }
 0x18a   :  { %v232_v54 = vsel %vm222_vm6, %v144_v51, -inf  ;;  %v221_v9 = vsel %vm220_vm7, %v144_v51, 0.0 }
 0x18b   :  { %233 = vmax.xlane.f32.xlu1 %v232_v54  ;;  %v223_v10 = vsel %vm222_vm6, %v221_v9, 0.0 }
 0x18f   :  { %255 = vmax.xlane.f32.xlu1 %v254_v55 }
 0x1c7   :  { %v577_v60 = vpop.permute.xlu0 %325 }
 0x1c8   :  { %v580_v61 = vmax.f32 %v305_v59, %v577_v60 }
 0x1ca   :  { %333 = vrot.lane.b32.xlu1 %v580_v61, %s506_s4  ;;  %v329_v15 = vsub.f32 %v305_v59, %v580_v61 }
 0x1cc   :  { %v330_v16 = vmul.f32 1.442695, %v329_v15 }
 0x214   :  { %v234_v62 = vpop.xlane.xlu1 %233 }
 0x215   :  { %v235_v63 = vsub.f32 %v144_v51, %v234_v62 }
 0x217   :  { %v236_v0 = vmul.f32 1.442695, %v235_v63 }
 0x218   :  { %v256_v1 = vpop.xlane.xlu1 %255 }
 0x219   :  { %422 = vpow2.f32 %v236_v0  ;;  %v257_v2 = vsub.f32 %v215_v53, %v256_v1 }
 0x21b   :  { %v258_v3 = vmul.f32 1.442695, %v257_v2 }
 0x21d   :  { %424 = vpow2.f32 %v258_v3 }
 0x226   :  { %v423_v5 = vpop.eup %422 }
 0x227   :  { %v238_v6 = vsel %vm222_vm6, %v423_v5, 0.0 }
 0x228   :  { %239 = vadd.xlane.f32.xlu0 %v238_v6 }
 0x22a   :  { %v425_v7 = vpop.eup %424 }
 0x22b   :  { %v260_v8 = vsel %vm222_vm6, %v425_v7, 0.0 }
 0x22c   :  { %261 = vadd.xlane.f32.xlu1 %v260_v8 }
 0x230   :  { %224 = vadd.xlane.f32.xlu1 %v223_v10 }
 0x23c   :  { %v334_v11 = vpop.permute.xlu1 %333 }
 0x23d   :  { %v336_v12 = vsub.f32 %v323_v47, %v334_v11 }
 0x23f   :  { %v337_v13 = vmul.f32 1.442695, %v336_v12 }
 0x241   :  { %426 = vpow2.f32 %v337_v13 }
 0x24e   :  { %v427_v14 = vpop.eup %426 }
 0x24f   :  { %340 = vrot.lane.b32.xlu0 %v427_v14, %s505_s30 }
 0x2b1   :  { %v240_v17 = vpop.xlane.xlu0 %239 }
 0x2b2   :  { %428 = vlog2.f32 %v240_v17 }
 0x2b3   :  { %430 = vpow2.f32 %v330_v16 }
 0x2b5   :  { %v262_v18 = vpop.xlane.xlu1 %261 }
 0x2b6   :  { %432 = vlog2.f32 %v262_v18 }
 0x2b9   :  { %v225_v19 = vpop.xlane.xlu1 %224 }
 0x2ba   :  { %v226_v20 = vrot.slane %v225_v19, 4 }
 0x2bc   :  { %v227_v23 = vadd.f32 %v226_v20, %v225_v19 }
 0x2be   :  { %v228_v31 = vrot.slane %v227_v23, 2 }
 0x2bf   :  { %v429_v21 = vpop.eup %428 }
 0x2c0   :  { %v242_v22 = vmul.f32 0.6931472, %v429_v21  ;;  %v431_v24 = vpop.eup %430  ;;  %v229_v36 = vadd.f32 %v228_v31, %v227_v23 }
 0x2c1   :  { %v341_v25 = vpop.permute.xlu0 %340 }
 0x2c2   :  { %v243_v26 = vadd.f32 %v242_v22, %v234_v62  ;;  %v343_v27 = vadd.f32 %v431_v24, %v341_v25  ;;  %v230_v40 = vrot.slane %v229_v36, 1 }
 0x2c3   :  { %v433_v28 = vpop.eup %432 }
 0x2c4   :  { %v245_v29 = vrot.slane %v243_v26, 4  ;;  %v264_v30 = vmul.f32 0.6931472, %v433_v28  ;;  %434 = vlog2.f32 %v343_v27  ;;  %v231_v45 = vadd.f32 %v230_v40, %v229_v36 }
 0x2c6   :  { %v246_v32 = vadd.f32 %v245_v29, %v243_v26  ;;  %v265_v33 = vadd.f32 %v264_v30, %v256_v1 }
 0x2c8   :  { %v247_v34 = vrot.slane %v246_v32, 2  ;;  %v267_v35 = vrot.slane %v265_v33, 4 }
 0x2ca   :  { %v248_v37 = vadd.f32 %v247_v34, %v246_v32  ;;  %v268_v38 = vadd.f32 %v267_v35, %v265_v33 }
 0x2cc   :  { %v269_v39 = vrot.slane %v268_v38, 2  ;;  %v249_v41 = vrot.slane %v248_v37, 1 }
 0x2ce   :  { %v270_v42 = vadd.f32 %v269_v39, %v268_v38  ;;  %v250_v43 = vadd.f32 %v249_v41, %v248_v37 }
 0x2d0   :  { %v271_v44 = vrot.slane %v270_v42, 1  ;;  %v251_v48 = vsub.f32 %v250_v43, %v231_v45 }
 0x2d1   :  { %v435_v46 = vpop.eup %434 }
 0x2d2   :  { %v272_v47 = vadd.f32 %v271_v44, %v270_v42  ;;  %v345_v49 = vmul.f32 0.6931472, %v435_v46  ;;  %v253_v52 = vmul.f32 0.125, %v251_v48 }
 0x2d4   :  { %v273_v50 = vsub.f32 %v272_v47, %v231_v45  ;;  %v346_v51 = vadd.f32 %v345_v49, %v580_v61 }
 0x2d6   :  { %v274_v53 = vmul.f32 0.125, %v273_v50  ;;  %v347_v54 = vsub.f32 %v346_v51, %v577_v60 }
 0x2d8   :  { %v350_v55 = vsel %vm349_vm8, %v347_v54, 0.0  ;;  %v275_v56 = vadd.f32 %v274_v53, %v253_v52 }
 0x2d9   :  { %v351_v57 = vrot.slane %v350_v55, 4 }
 0x2da   :  { %v276_v58 = vmul.f32 0.5, %v275_v56 }
 0x2db   :  { %v352_v59 = vadd.f32 %v351_v57, %v350_v55 }
 0x2dc   :  { %278 = vst.msk [vmem:[#allocation5] sm:$0x1] %vm277_vm9, %v276_v58 }
 0x2dd   :  { %467 = shalt.err (!%p464_p9)
}
 0x2de   :  { %368 = dma.vmem_to_hbm [thread:$0]  %s366_s8, 16, %s605_s5, [#allocation4]   ;;  %v353_v60 = vrot.slane %v352_v59, 2 }
 0x2df   :  { %s508_s13 = smov [#allocation6]  }
 0x2e0   :  { %v354_v61 = vadd.f32 %v353_v60, %v352_v59  ;;  %s375_s14 = sshll.u32 %s508_s13, 4  ;;  %s376_s14 = int_to_ptr.vmem [resolvable:$true] %s375_s14 }
 0x2e1   :  { %s476_s15 = scalar_lea.vmem %s376_s14, 16  ;;  %s480_s16 = scalar_lea.vmem %s376_s14, 32 }
 0x2e2   :  { %v355_v62 = vrot.slane %v354_v61, 1  ;;  %p477_p10 = scmp.ne.s32.totalorder %s376_s14, %s476_s15  ;;  %p481_p11 = scmp.lt.s32.totalorder %s376_s14, %s376_s14 }
 0x2e3   :  { %p482_p12 = scmp.lt.s32.totalorder %s480_s16, %s476_s15 }
 0x2e4   :  { %v356_v63 = vadd.f32 %v355_v62, %v354_v61 }
 0x2e5   :  { %p483_p13 = por %p482_p12, %p481_p11 }
 0x2e6   :  { %v357_v0 = vmul.f32 0.125, %v356_v63 }
 0x2e7   :  { %p484_p0 = pnand %p483_p13, %p477_p10 }
 0x2e8   :  { %358 = vst.msk [vmem:[#allocation6] sm:$0x1] %vm277_vm9, %v357_v0 }
 0x2e9   :  { %487 = shalt.err (!%p484_p0)
}
 0x2ea   :  { %378 = dma.vmem_to_hbm [thread:$0]  %s376_s14, 16, %s606_s6, [#allocation7]  }
 0x2eb   :  { %498 = dma.done.wait [#allocation4], 16  }
 0x2ec   :  { %499 = vsyncadd [#allocation4], 4294967280 }
 0x2ed   :  { %500 = dma.done.wait [#allocation7], 16  }
 0x2ee   :  { %501 = vsyncadd [#allocation7], 4294967280 }
 0x2ef   :  { %385 = vsyncpa [#allocation3], 1 }
 0x2f0   :  { %386 = vsyncpa [#allocation4], 1 }
 0x2f1   :  { %387 = vsyncpa [#allocation7], 1 }

</bundles_post_ra>
